<compile_context>
chip_gen: v5e
topology: v5e:2x2
jax: 0.10.0
libtpu: 0.0.40
codegen_flags: <defaults>
</compile_context>

<pallas_src>
import functools
import numpy as np
import jax
import jax.numpy as jnp
from jax import lax
from jax.experimental import pallas as pl
from jax.experimental.pallas import tpu as pltpu


# dot_general dimension numbers for transposed 2-D matmuls (what pl.dot's
# trans_a / trans_b express).
_TRANS_A = (((0,), (0,)), ((), ()))   # A^T @ B   (contract dim 0 of both)
_TRANS_B = (((1,), (1,)), ((), ()))   # A  @ B^T  (contract dim 1 of both)


# ----------------------------------------------------------------------------- kernel
def _attn_kernel(xq_ref, xk_ref, xv_ref,
                 w_ref, b_ref, wo_ref, bo_ref, d_ref,
                 o_ref, kv_ref, *,
                 num_heads, head_dim, gamma, coef, skip_q_proj, mxu_dtype):
    _, T, E = xq_ref.shape
    H, DH = num_heads, head_dim
    HD = H * DH
    f32 = jnp.float32

    # -------- fused projections: one MXU dot per stream (N = H*DH), f32 accum --------
    # Weight streams: [K, V] when the zero-W_Q projection is skipped, else [Q, K, V].
    ik, iv = (0, 1) if skip_q_proj else (1, 2)

    xk = xk_ref[0].astype(mxu_dtype)                                    # (T, E)
    xv = xv_ref[0].astype(mxu_dtype)
    k_all = jnp.dot(xk, w_ref[ik], preferred_element_type=f32) + b_ref[1]   # (T, HD)
    v_all = jnp.dot(xv, w_ref[iv], preferred_element_type=f32) + b_ref[2]

    if skip_q_proj:
        # W_Q == 0 in the module (_reset_parameters), so Query == b_q at every
        # position: skip the dead matmul (and its weight DMA stream).
        q_all = jnp.broadcast_to(b_ref[0], (T, HD))
    else:
        xq = xq_ref[0].astype(mxu_dtype)
        q_all = jnp.dot(xq, w_ref[0], preferred_element_type=f32) + b_ref[0]

    # Feature-major ("transposed") layout: features on sublanes, sequence on lanes.
    # Per-head slices below are then 8-sublane-tile aligned -> no lane relayouts.
    q_all_t = (coef * q_all).T                                          # coef folded once
    k_all_t = k_all.T                                                   # (HD, T)
    v_all_t = v_all.T

    # -------- causal mask, built once in-kernel (no [T,T] HBM traffic) ---------------
    row = lax.broadcasted_iota(jnp.int32, (T, T), 0)
    col = lax.broadcasted_iota(jnp.int32, (T, T), 1)
    causal = col <= row
    neg_gamma = f32(-gamma)

    # -------- per-head attention: plain 2-D dots on sublane-aligned tiles ------------
    head_outs_t = []
    for h in range(H):                                                  # static unroll
        rows = slice(h * DH, (h + 1) * DH)                              # sublane-aligned
        q_h_t = q_all_t[rows, :].astype(mxu_dtype)                      # (DH, T) == Q_h^T
        k_h_t = k_all_t[rows, :].astype(mxu_dtype)
        v_h_t = v_all_t[rows, :].astype(mxu_dtype)

        # scores = Q_h @ K_h^T  (contraction over DH), f32 accumulation
        s = lax.dot_general(q_h_t, k_h_t, _TRANS_A, preferred_element_type=f32)  # (Tq,Tk)
        logits = jnp.where(causal, s, neg_gamma)                        # exact for 0/1 mask

        m = jnp.max(logits, axis=-1, keepdims=True)                     # softmax in f32
        e = jnp.exp(logits - m)
        p = e * pl.reciprocal(jnp.sum(e, axis=-1, keepdims=True), approx=True)

        # (P_h @ V_h)^T = V_h^T @ P_h^T : wide-N MXU dot; the head output lands on
        # the sublane axis so the cross-head concat below is tile-aligned.
        head_outs_t.append(
            lax.dot_general(v_h_t, p.astype(mxu_dtype), _TRANS_B,
                            preferred_element_type=f32))                # (DH, Tq)

    concat_t = jnp.concatenate(head_outs_t, axis=0)                     # (HD, T) sublane concat
    concat_t = concat_t * d_ref[...]                                    # diag(D) over queries, hoisted

    # -------- output projection: single fused K = H*DH matmul ------------------------
    out = lax.dot_general(concat_t.astype(mxu_dtype), wo_ref[...], _TRANS_A,
                          preferred_element_type=f32) + bo_ref[...]     # (T, E)
    o_ref[...] = out.reshape(1, T, E).astype(o_ref.dtype)

    # -------- use_cache: last head's Key / Value straight from VMEM ------------------
    kv_ref[...] = jnp.concatenate(
        [k_all_t[HD - DH:, :], v_all_t[HD - DH:, :]], axis=0
    ).reshape(1, 2 * DH, T).astype(kv_ref.dtype)


# ----------------------------------------------------------------------------- wrapper
def attention_without_shortcuts(q1, k1, v1, params, *, gamma=1000.0,
                                mxu_dtype=jnp.bfloat16, skip_q_proj=True):
    """Self-attention forward.  Returns (out [B,T,E], (Key, Value) of the last head)."""
    B, T, E = q1.shape
    H = params["num_heads"]
    DH = params["wk_t"].shape[-1]
    HD = H * DH
    coef = 1.0 / float(np.sqrt(E / H))                                  # 1 / sqrt(head_dim)

    # ---- pack per-head weights into fused-matmul operands (layout plumbing) ----
    def head_concat(w):                                                 # [H,E,DH] -> [E,H*DH]
        return jnp.transpose(w, (1, 0, 2)).reshape(E, HD)

    streams = [] if skip_q_proj else [head_concat(params["wq_t"])]
    streams += [head_concat(params["wk_t"]), head_concat(params["wv_t"])]
    w_pack = jnp.stack(streams, axis=0).astype(mxu_dtype)               # (2|3, E, HD) bf16
    b_pack = jnp.stack([jnp.tile(params["bq"], (1, H)),
                        jnp.tile(params["bk"], (1, H)),
                        jnp.tile(params["bv"], (1, H))], axis=0).astype(jnp.float32)
    wo_t = params["wo_t"].astype(mxu_dtype)                             # (HD, E)
    bo = params["bo"].astype(jnp.float32)                               # (1, E)
    dvec = params["dvec"].reshape(1, T).astype(jnp.float32)             # (1, T) diag of D

    kernel = functools.partial(
        _attn_kernel, num_heads=H, head_dim=DH, gamma=float(gamma), coef=coef,
        skip_q_proj=skip_q_proj, mxu_dtype=mxu_dtype)

    seq_spec = pl.BlockSpec((1, T, E), lambda b: (b, 0, 0))

    def const(arr):                                                     # whole-array resident block
        return pl.BlockSpec(arr.shape, lambda b, _n=arr.ndim: (0,) * _n)

    main_spec = pl.BlockSpec((1, T, E), lambda b: (b, 0, 0))
    kv_spec = pl.BlockSpec((1, 2 * DH, T), lambda b: (b, 0, 0))

    out, kv = pl.pallas_call(
        kernel,
        out_shape=(jax.ShapeDtypeStruct((B, T, E), jnp.float32),
                   jax.ShapeDtypeStruct((B, 2 * DH, T), jnp.float32)),
        grid_spec=pltpu.PrefetchScalarGridSpec(
            num_scalar_prefetch=0,
            grid=(B,),                      # one batch element per step: double-buffered
                                            # DMA + megacore sharding; rows/step = T.
            in_specs=[seq_spec, seq_spec, seq_spec,
                      const(w_pack), const(b_pack), const(wo_t), const(bo), const(dvec)],
            out_specs=[main_spec, kv_spec]),
        compiler_params=pltpu.CompilerParams(dimension_semantics=("parallel",)),
    )(q1, k1, v1, w_pack, b_pack, wo_t, bo, dvec)

    key_last = jnp.swapaxes(kv[:, :DH, :], 1, 2)                        # (B, T, DH)
    value_last = jnp.swapaxes(kv[:, DH:, :], 1, 2)
    return out, (key_last, value_last)


# ----------------------------------------------------------------------------- glue: params
def _orthogonal(key, out_f, in_f):
    """Deterministic orthogonal init (rows/cols orthonormal), shape [out_f, in_f]."""
    a = jax.random.normal(key, (max(out_f, in_f), min(out_f, in_f)), dtype=jnp.float32)
    q, r = jnp.linalg.qr(a)
    q = q * jnp.sign(jnp.diagonal(r))[None, :]
    if out_f < in_f:
        q = q.T
    return q.astype(jnp.float32)


def _d_diagonal(T):
    # current_layer == 1: eigenmatrix_generator returns identity for both gammas,
    # so A = chol(I) @ inv(chol(I)) = I and D = diag(rowsum(A)) = I.
    L_in = jnp.eye(T, dtype=jnp.float32)
    L_out = jnp.eye(T, dtype=jnp.float32)
    A = jnp.linalg.cholesky(L_out) @ jnp.linalg.inv(jnp.linalg.cholesky(L_in))
    return jnp.sum(A, axis=-1)                                          # (T,)


def make_params(key, T, E, H):
    DH = E // H
    scale = 1.0 / np.sqrt(E)
    ks = jax.random.split(key, 4 + 2 * H)

    # W_Q is re-init to constant 0 every head iteration in the PyTorch module.
    wq_t = jnp.zeros((H, E, DH), jnp.float32)
    # W_K / W_V: fresh orthogonal * 1/sqrt(E) per head.
    wk_t = jnp.stack([_orthogonal(ks[4 + h], DH, E).T * scale for h in range(H)])
    wv_t = jnp.stack([_orthogonal(ks[4 + H + h], DH, E).T * scale for h in range(H)])
    # Biases: PyTorch Linear default U(-1/sqrt(in), 1/sqrt(in)); shared across heads.
    bound = 1.0 / np.sqrt(E)
    bq = jax.random.uniform(ks[0], (1, DH), jnp.float32, -bound, bound)
    bk = jax.random.uniform(ks[1], (1, DH), jnp.float32, -bound, bound)
    bv = jax.random.uniform(ks[2], (1, DH), jnp.float32, -bound, bound)
    # W_O: orthogonal * 1/sqrt(E); stored transposed [H*DH, E].
    wo = _orthogonal(ks[3], E, H * DH) * scale
    bo = jax.random.uniform(jax.random.fold_in(key, 99), (1, E), jnp.float32,
                            -1.0 / np.sqrt(H * DH), 1.0 / np.sqrt(H * DH))
    return dict(num_heads=H, wq_t=wq_t, wk_t=wk_t, wv_t=wv_t,
                bq=bq, bk=bk, bv=bv, wo_t=wo.T, bo=bo, dvec=_d_diagonal(T))


# ----------------------------------------------------------------------------- pure-JAX reference
def reference(q1, k1, v1, params, gamma=1000.0):
    B, T, E = q1.shape
    H, _, DH = params["wk_t"].shape
    coef = 1.0 / np.sqrt(E / H)
    mask = jnp.tril(jnp.ones((T, T), jnp.float32))
    d = params["dvec"]
    heads = []
    for h in range(H):
        Q = q1 @ params["wq_t"][h] + params["bq"][0]
        K = k1 @ params["wk_t"][h] + params["bk"][0]
        V = v1 @ params["wv_t"][h] + params["bv"][0]
        scores = coef * jnp.einsum("btd,bsd->bts", Q, K)
        logits = mask * scores - gamma * (1.0 - mask)
        P = jax.nn.softmax(logits, axis=-1)
        heads.append(jnp.einsum("bts,bsd->btd", d[None, :, None] * P, V))
    concat = jnp.concatenate(heads, axis=-1)
    return concat @ params["wo_t"] + params["bo"][0]


# ----------------------------------------------------------------------------- main
if __name__ == "__main__":
    B, T, E, H = 2, 8, 32, 4          # batch, sequence_length, embedding_dim, num_heads
    Gamma = 1000.0

    root = jax.random.PRNGKey(0)
    k_par, k_q, k_k, k_v = jax.random.split(root, 4)

    params = make_params(k_par, T, E, H)
    q1 = jax.random.normal(k_q, (B, T, E), jnp.float32)
    k1 = jax.random.normal(k_k, (B, T, E), jnp.float32)
    v1 = jax.random.normal(k_v, (B, T, E), jnp.float32)

    ref = jax.block_until_ready(reference(q1, k1, v1, params, gamma=Gamma))

    # 1) f32 MXU path, general code path (Q projection not skipped): tight check.
    #    (Only the EUP approx reciprocal separates it from the exact reference.)
    out32, _ = attention_without_shortcuts(q1, k1, v1, params, gamma=Gamma,
                                           mxu_dtype=jnp.float32, skip_q_proj=False)
    out32 = jax.block_until_ready(out32)
    assert out32.shape == (B, T, E)
    assert np.allclose(np.asarray(out32), np.asarray(ref), rtol=2e-3, atol=2e-3), \
        "f32 kernel mismatch vs reference"

    # 2) production config: bf16 MXU operands (f32 accumulate / f32 softmax), the
    #    dead zero-W_Q projection skipped.  Tolerance covers bf16 + approx recip.
    out_bf, (key_last, value_last) = attention_without_shortcuts(
        q1, k1, v1, params, gamma=Gamma)
    out_bf = jax.block_until_ready(out_bf)
    assert out_bf.shape == (B, T, E)
    assert np.allclose(np.asarray(out_bf), np.asarray(ref), rtol=1e-2, atol=1e-2), \
        "bf16 kernel mismatch vs reference"

    # 3) use_cache glue: last head's Key / Value come straight from the kernel.
    key_ref = k1 @ params["wk_t"][H - 1] + params["bk"][0]
    val_ref = v1 @ params["wv_t"][H - 1] + params["bv"][0]
    assert np.allclose(np.asarray(key_last), np.asarray(key_ref), rtol=1e-2, atol=1e-2), \
        "present Key mismatch"
    assert np.allclose(np.asarray(value_last), np.asarray(val_ref), rtol=1e-2, atol=1e-2), \
        "present Value mismatch"

    print("KERNEL_OK")
</pallas_src>

<mosaic_0001>
module attributes {stable_mosaic.version = 11 : i64} {
  func.func @_attn_kernel(%arg0: i32, %arg1: memref<1x8x32xf32, #tpu.memory_space<vmem>>, %arg2: memref<1x8x32xf32, #tpu.memory_space<vmem>>, %arg3: memref<1x8x32xf32, #tpu.memory_space<vmem>>, %arg4: memref<3x32x32xf32, #tpu.memory_space<vmem>>, %arg5: memref<3x1x32xf32, #tpu.memory_space<vmem>>, %arg6: memref<32x32xf32, #tpu.memory_space<vmem>>, %arg7: memref<1x32xf32, #tpu.memory_space<vmem>>, %arg8: memref<1x8xf32, #tpu.memory_space<vmem>>, %arg9: memref<1x8x32xf32, #tpu.memory_space<vmem>>, %arg10: memref<1x16x8xf32, #tpu.memory_space<vmem>>) attributes {dimension_semantics = [#tpu.dimension_semantics<parallel>], iteration_bounds = array<i64: 2>, scalar_prefetch = 0 : i64, scratch_operands = 0 : i64, tpu.core_type = #tpu.core_type<tc>, window_params = [{transform_indices = @transform_0, window_bounds = array<i64: 1, 8, 32>}, {transform_indices = @transform_1, window_bounds = array<i64: 1, 8, 32>}, {transform_indices = @transform_2, window_bounds = array<i64: 1, 8, 32>}, {pipeline_mode = #tpu.pipeline_mode<synchronous>, transform_indices = @transform_3, window_bounds = array<i64: 3, 32, 32>}, {pipeline_mode = #tpu.pipeline_mode<synchronous>, transform_indices = @transform_4, window_bounds = array<i64: 3, 1, 32>}, {pipeline_mode = #tpu.pipeline_mode<synchronous>, transform_indices = @transform_5, window_bounds = array<i64: 32, 32>}, {pipeline_mode = #tpu.pipeline_mode<synchronous>, transform_indices = @transform_6, window_bounds = array<i64: 1, 32>}, {pipeline_mode = #tpu.pipeline_mode<synchronous>, transform_indices = @transform_7, window_bounds = array<i64: 1, 8>}, {transform_indices = @transform_8, window_bounds = array<i64: 1, 8, 32>}, {transform_indices = @transform_9, window_bounds = array<i64: 1, 16, 8>}]} {
    %c0 = arith.constant 0 : index
    %c0_0 = arith.constant 0 : index
    %c0_1 = arith.constant 0 : index
    %0 = vector.load %arg2[%c0, %c0_0, %c0_1] : memref<1x8x32xf32, #tpu.memory_space<vmem>>, vector<1x8x32xf32>
    %1 = vector.shape_cast %0 : vector<1x8x32xf32> to vector<8x32xf32>
    %c0_2 = arith.constant 0 : index
    %c0_3 = arith.constant 0 : index
    %c0_4 = arith.constant 0 : index
    %2 = vector.load %arg3[%c0_2, %c0_3, %c0_4] : memref<1x8x32xf32, #tpu.memory_space<vmem>>, vector<1x8x32xf32>
    %3 = vector.shape_cast %2 : vector<1x8x32xf32> to vector<8x32xf32>
    %c1 = arith.constant 1 : index
    %c0_5 = arith.constant 0 : index
    %c0_6 = arith.constant 0 : index
    %4 = vector.load %arg4[%c1, %c0_5, %c0_6] : memref<3x32x32xf32, #tpu.memory_space<vmem>>, vector<1x32x32xf32>
    %5 = vector.shape_cast %4 : vector<1x32x32xf32> to vector<32x32xf32>
    %cst = arith.constant dense<0.000000e+00> : vector<8x32xf32>
    %6 = tpu.matmul %1, %5, %cst {dimension_numbers = #tpu.dot_dimension_numbers<[1], [0], [0], [1], [0, 0, 1, 1], [], []>} : vector<8x32xf32>, vector<32x32xf32>, vector<8x32xf32> -> vector<8x32xf32>
    %c1_7 = arith.constant 1 : index
    %c0_8 = arith.constant 0 : index
    %c0_9 = arith.constant 0 : index
    %7 = vector.load %arg5[%c1_7, %c0_8, %c0_9] : memref<3x1x32xf32, #tpu.memory_space<vmem>>, vector<1x1x32xf32>
    %8 = vector.shape_cast %7 : vector<1x1x32xf32> to vector<1x32xf32>
    %9 = vector.broadcast %8 : vector<1x32xf32> to vector<8x32xf32>
    %10 = arith.addf %6, %9 : vector<8x32xf32>
    %c2 = arith.constant 2 : index
    %c0_10 = arith.constant 0 : index
    %c0_11 = arith.constant 0 : index
    %11 = vector.load %arg4[%c2, %c0_10, %c0_11] : memref<3x32x32xf32, #tpu.memory_space<vmem>>, vector<1x32x32xf32>
    %12 = vector.shape_cast %11 : vector<1x32x32xf32> to vector<32x32xf32>
    %cst_12 = arith.constant dense<0.000000e+00> : vector<8x32xf32>
    %13 = tpu.matmul %3, %12, %cst_12 {dimension_numbers = #tpu.dot_dimension_numbers<[1], [0], [0], [1], [0, 0, 1, 1], [], []>} : vector<8x32xf32>, vector<32x32xf32>, vector<8x32xf32> -> vector<8x32xf32>
    %c2_13 = arith.constant 2 : index
    %c0_14 = arith.constant 0 : index
    %c0_15 = arith.constant 0 : index
    %14 = vector.load %arg5[%c2_13, %c0_14, %c0_15] : memref<3x1x32xf32, #tpu.memory_space<vmem>>, vector<1x1x32xf32>
    %15 = vector.shape_cast %14 : vector<1x1x32xf32> to vector<1x32xf32>
    %16 = vector.broadcast %15 : vector<1x32xf32> to vector<8x32xf32>
    %17 = arith.addf %13, %16 : vector<8x32xf32>
    %c0_16 = arith.constant 0 : index
    %c0_17 = arith.constant 0 : index
    %c0_18 = arith.constant 0 : index
    %18 = vector.load %arg1[%c0_16, %c0_17, %c0_18] : memref<1x8x32xf32, #tpu.memory_space<vmem>>, vector<1x8x32xf32>
    %19 = vector.shape_cast %18 : vector<1x8x32xf32> to vector<8x32xf32>
    %c0_19 = arith.constant 0 : index
    %c0_20 = arith.constant 0 : index
    %c0_21 = arith.constant 0 : index
    %20 = vector.load %arg4[%c0_19, %c0_20, %c0_21] : memref<3x32x32xf32, #tpu.memory_space<vmem>>, vector<1x32x32xf32>
    %21 = vector.shape_cast %20 : vector<1x32x32xf32> to vector<32x32xf32>
    %cst_22 = arith.constant dense<0.000000e+00> : vector<8x32xf32>
    %22 = tpu.matmul %19, %21, %cst_22 {dimension_numbers = #tpu.dot_dimension_numbers<[1], [0], [0], [1], [0, 0, 1, 1], [], []>} : vector<8x32xf32>, vector<32x32xf32>, vector<8x32xf32> -> vector<8x32xf32>
    %c0_23 = arith.constant 0 : index
    %c0_24 = arith.constant 0 : index
    %c0_25 = arith.constant 0 : index
    %23 = vector.load %arg5[%c0_23, %c0_24, %c0_25] : memref<3x1x32xf32, #tpu.memory_space<vmem>>, vector<1x1x32xf32>
    %24 = vector.shape_cast %23 : vector<1x1x32xf32> to vector<1x32xf32>
    %25 = vector.broadcast %24 : vector<1x32xf32> to vector<8x32xf32>
    %26 = arith.addf %22, %25 : vector<8x32xf32>
    %cst_26 = arith.constant 0.353553385 : f32
    %27 = vector.broadcast %cst_26 : f32 to vector<8x32xf32>
    %28 = arith.mulf %27, %26 : vector<8x32xf32>
    %29 = tpu.transpose %28, [1, 0] : vector<8x32xf32> -> vector<32x8xf32>
    %30 = tpu.transpose %10, [1, 0] : vector<8x32xf32> -> vector<32x8xf32>
    %31 = tpu.transpose %17, [1, 0] : vector<8x32xf32> -> vector<32x8xf32>
    %32 = tpu.iota {dimensions = array<i32: 0>} : vector<8x8xi32>
    %33 = tpu.iota {dimensions = array<i32: 1>} : vector<8x8xi32>
    %34 = arith.cmpi sle, %33, %32 : vector<8x8xi32>
    %35 = vector.extract_strided_slice %29 {offsets = [0, 0], sizes = [8, 8], strides = [1, 1]} : vector<32x8xf32> to vector<8x8xf32>
    %36 = vector.extract_strided_slice %30 {offsets = [0, 0], sizes = [8, 8], strides = [1, 1]} : vector<32x8xf32> to vector<8x8xf32>
    %37 = vector.extract_strided_slice %31 {offsets = [0, 0], sizes = [8, 8], strides = [1, 1]} : vector<32x8xf32> to vector<8x8xf32>
    %cst_27 = arith.constant dense<0.000000e+00> : vector<8x8xf32>
    %38 = tpu.matmul %35, %36, %cst_27 {dimension_numbers = #tpu.dot_dimension_numbers<[0], [0], [1], [1], [0, 1, 1, 1], [], []>} : vector<8x8xf32>, vector<8x8xf32>, vector<8x8xf32> -> vector<8x8xf32>
    %cst_28 = arith.constant -1.000000e+03 : f32
    %39 = vector.broadcast %cst_28 : f32 to vector<8x8xf32>
    %40 = arith.select %34, %38, %39 : vector<8x8xi1>, vector<8x8xf32>
    %cst_29 = arith.constant dense<0xFF800000> : vector<8xf32>
    %41 = vector.multi_reduction <maximumf>, %40, %cst_29 [1] : vector<8x8xf32> to vector<8xf32>
    %42 = vector.shape_cast %41 : vector<8xf32> to vector<8x1xf32>
    %43 = vector.broadcast %42 : vector<8x1xf32> to vector<8x8xf32>
    %44 = arith.subf %40, %43 : vector<8x8xf32>
    %45 = math.exp %44 : vector<8x8xf32>
    %cst_30 = arith.constant dense<0.000000e+00> : vector<8xf32>
    %46 = vector.multi_reduction <add>, %45, %cst_30 [1] : vector<8x8xf32> to vector<8xf32>
    %47 = vector.shape_cast %46 : vector<8xf32> to vector<8x1xf32>
    %48 = tpu.reciprocal %47 {approx = true} : vector<8x1xf32> -> vector<8x1xf32>
    %49 = vector.broadcast %48 : vector<8x1xf32> to vector<8x8xf32>
    %50 = arith.mulf %45, %49 : vector<8x8xf32>
    %cst_31 = arith.constant dense<0.000000e+00> : vector<8x8xf32>
    %51 = tpu.matmul %37, %50, %cst_31 {dimension_numbers = #tpu.dot_dimension_numbers<[1], [1], [0], [0], [0, 0, 1, 0], [], []>} : vector<8x8xf32>, vector<8x8xf32>, vector<8x8xf32> -> vector<8x8xf32>
    %52 = vector.extract_strided_slice %29 {offsets = [8, 0], sizes = [8, 8], strides = [1, 1]} : vector<32x8xf32> to vector<8x8xf32>
    %53 = vector.extract_strided_slice %30 {offsets = [8, 0], sizes = [8, 8], strides = [1, 1]} : vector<32x8xf32> to vector<8x8xf32>
    %54 = vector.extract_strided_slice %31 {offsets = [8, 0], sizes = [8, 8], strides = [1, 1]} : vector<32x8xf32> to vector<8x8xf32>
    %cst_32 = arith.constant dense<0.000000e+00> : vector<8x8xf32>
    %55 = tpu.matmul %52, %53, %cst_32 {dimension_numbers = #tpu.dot_dimension_numbers<[0], [0], [1], [1], [0, 1, 1, 1], [], []>} : vector<8x8xf32>, vector<8x8xf32>, vector<8x8xf32> -> vector<8x8xf32>
    %cst_33 = arith.constant -1.000000e+03 : f32
    %56 = vector.broadcast %cst_33 : f32 to vector<8x8xf32>
    %57 = arith.select %34, %55, %56 : vector<8x8xi1>, vector<8x8xf32>
    %cst_34 = arith.constant dense<0xFF800000> : vector<8xf32>
    %58 = vector.multi_reduction <maximumf>, %57, %cst_34 [1] : vector<8x8xf32> to vector<8xf32>
    %59 = vector.shape_cast %58 : vector<8xf32> to vector<8x1xf32>
    %60 = vector.broadcast %59 : vector<8x1xf32> to vector<8x8xf32>
    %61 = arith.subf %57, %60 : vector<8x8xf32>
    %62 = math.exp %61 : vector<8x8xf32>
    %cst_35 = arith.constant dense<0.000000e+00> : vector<8xf32>
    %63 = vector.multi_reduction <add>, %62, %cst_35 [1] : vector<8x8xf32> to vector<8xf32>
    %64 = vector.shape_cast %63 : vector<8xf32> to vector<8x1xf32>
    %65 = tpu.reciprocal %64 {approx = true} : vector<8x1xf32> -> vector<8x1xf32>
    %66 = vector.broadcast %65 : vector<8x1xf32> to vector<8x8xf32>
    %67 = arith.mulf %62, %66 : vector<8x8xf32>
    %cst_36 = arith.constant dense<0.000000e+00> : vector<8x8xf32>
    %68 = tpu.matmul %54, %67, %cst_36 {dimension_numbers = #tpu.dot_dimension_numbers<[1], [1], [0], [0], [0, 0, 1, 0], [], []>} : vector<8x8xf32>, vector<8x8xf32>, vector<8x8xf32> -> vector<8x8xf32>
    %69 = vector.extract_strided_slice %29 {offsets = [16, 0], sizes = [8, 8], strides = [1, 1]} : vector<32x8xf32> to vector<8x8xf32>
    %70 = vector.extract_strided_slice %30 {offsets = [16, 0], sizes = [8, 8], strides = [1, 1]} : vector<32x8xf32> to vector<8x8xf32>
    %71 = vector.extract_strided_slice %31 {offsets = [16, 0], sizes = [8, 8], strides = [1, 1]} : vector<32x8xf32> to vector<8x8xf32>
    %cst_37 = arith.constant dense<0.000000e+00> : vector<8x8xf32>
    %72 = tpu.matmul %69, %70, %cst_37 {dimension_numbers = #tpu.dot_dimension_numbers<[0], [0], [1], [1], [0, 1, 1, 1], [], []>} : vector<8x8xf32>, vector<8x8xf32>, vector<8x8xf32> -> vector<8x8xf32>
    %cst_38 = arith.constant -1.000000e+03 : f32
    %73 = vector.broadcast %cst_38 : f32 to vector<8x8xf32>
    %74 = arith.select %34, %72, %73 : vector<8x8xi1>, vector<8x8xf32>
    %cst_39 = arith.constant dense<0xFF800000> : vector<8xf32>
    %75 = vector.multi_reduction <maximumf>, %74, %cst_39 [1] : vector<8x8xf32> to vector<8xf32>
    %76 = vector.shape_cast %75 : vector<8xf32> to vector<8x1xf32>
    %77 = vector.broadcast %76 : vector<8x1xf32> to vector<8x8xf32>
    %78 = arith.subf %74, %77 : vector<8x8xf32>
    %79 = math.exp %78 : vector<8x8xf32>
    %cst_40 = arith.constant dense<0.000000e+00> : vector<8xf32>
    %80 = vector.multi_reduction <add>, %79, %cst_40 [1] : vector<8x8xf32> to vector<8xf32>
    %81 = vector.shape_cast %80 : vector<8xf32> to vector<8x1xf32>
    %82 = tpu.reciprocal %81 {approx = true} : vector<8x1xf32> -> vector<8x1xf32>
    %83 = vector.broadcast %82 : vector<8x1xf32> to vector<8x8xf32>
    %84 = arith.mulf %79, %83 : vector<8x8xf32>
    %cst_41 = arith.constant dense<0.000000e+00> : vector<8x8xf32>
    %85 = tpu.matmul %71, %84, %cst_41 {dimension_numbers = #tpu.dot_dimension_numbers<[1], [1], [0], [0], [0, 0, 1, 0], [], []>} : vector<8x8xf32>, vector<8x8xf32>, vector<8x8xf32> -> vector<8x8xf32>
    %86 = vector.extract_strided_slice %29 {offsets = [24, 0], sizes = [8, 8], strides = [1, 1]} : vector<32x8xf32> to vector<8x8xf32>
    %87 = vector.extract_strided_slice %30 {offsets = [24, 0], sizes = [8, 8], strides = [1, 1]} : vector<32x8xf32> to vector<8x8xf32>
    %88 = vector.extract_strided_slice %31 {offsets = [24, 0], sizes = [8, 8], strides = [1, 1]} : vector<32x8xf32> to vector<8x8xf32>
    %cst_42 = arith.constant dense<0.000000e+00> : vector<8x8xf32>
    %89 = tpu.matmul %86, %87, %cst_42 {dimension_numbers = #tpu.dot_dimension_numbers<[0], [0], [1], [1], [0, 1, 1, 1], [], []>} : vector<8x8xf32>, vector<8x8xf32>, vector<8x8xf32> -> vector<8x8xf32>
    %cst_43 = arith.constant -1.000000e+03 : f32
    %90 = vector.broadcast %cst_43 : f32 to vector<8x8xf32>
    %91 = arith.select %34, %89, %90 : vector<8x8xi1>, vector<8x8xf32>
    %cst_44 = arith.constant dense<0xFF800000> : vector<8xf32>
    %92 = vector.multi_reduction <maximumf>, %91, %cst_44 [1] : vector<8x8xf32> to vector<8xf32>
    %93 = vector.shape_cast %92 : vector<8xf32> to vector<8x1xf32>
    %94 = vector.broadcast %93 : vector<8x1xf32> to vector<8x8xf32>
    %95 = arith.subf %91, %94 : vector<8x8xf32>
    %96 = math.exp %95 : vector<8x8xf32>
    %cst_45 = arith.constant dense<0.000000e+00> : vector<8xf32>
    %97 = vector.multi_reduction <add>, %96, %cst_45 [1] : vector<8x8xf32> to vector<8xf32>
    %98 = vector.shape_cast %97 : vector<8xf32> to vector<8x1xf32>
    %99 = tpu.reciprocal %98 {approx = true} : vector<8x1xf32> -> vector<8x1xf32>
    %100 = vector.broadcast %99 : vector<8x1xf32> to vector<8x8xf32>
    %101 = arith.mulf %96, %100 : vector<8x8xf32>
    %cst_46 = arith.constant dense<0.000000e+00> : vector<8x8xf32>
    %102 = tpu.matmul %88, %101, %cst_46 {dimension_numbers = #tpu.dot_dimension_numbers<[1], [1], [0], [0], [0, 0, 1, 0], [], []>} : vector<8x8xf32>, vector<8x8xf32>, vector<8x8xf32> -> vector<8x8xf32>
    %103 = tpu.concatenate %51, %68, %85, %102 in 0 : vector<8x8xf32>, vector<8x8xf32>, vector<8x8xf32>, vector<8x8xf32> -> vector<32x8xf32>
    %c0_47 = arith.constant 0 : index
    %c0_48 = arith.constant 0 : index
    %104 = vector.load %arg8[%c0_47, %c0_48] : memref<1x8xf32, #tpu.memory_space<vmem>>, vector<1x8xf32>
    %105 = vector.broadcast %104 : vector<1x8xf32> to vector<32x8xf32>
    %106 = arith.mulf %103, %105 : vector<32x8xf32>
    %c0_49 = arith.constant 0 : index
    %c0_50 = arith.constant 0 : index
    %107 = vector.load %arg6[%c0_49, %c0_50] : memref<32x32xf32, #tpu.memory_space<vmem>>, vector<32x32xf32>
    %cst_51 = arith.constant dense<0.000000e+00> : vector<8x32xf32>
    %108 = tpu.matmul %106, %107, %cst_51 {dimension_numbers = #tpu.dot_dimension_numbers<[0], [0], [1], [1], [0, 1, 1, 1], [], []>} : vector<32x8xf32>, vector<32x32xf32>, vector<8x32xf32> -> vector<8x32xf32>
    %c0_52 = arith.constant 0 : index
    %c0_53 = arith.constant 0 : index
    %109 = vector.load %arg7[%c0_52, %c0_53] : memref<1x32xf32, #tpu.memory_space<vmem>>, vector<1x32xf32>
    %110 = vector.broadcast %109 : vector<1x32xf32> to vector<8x32xf32>
    %111 = arith.addf %108, %110 : vector<8x32xf32>
    %112 = vector.shape_cast %111 : vector<8x32xf32> to vector<1x8x32xf32>
    %c0_54 = arith.constant 0 : index
    %c0_55 = arith.constant 0 : index
    %c0_56 = arith.constant 0 : index
    %113 = vector.load %arg9[%c0_54, %c0_55, %c0_56] : memref<1x8x32xf32, #tpu.memory_space<vmem>>, vector<1x8x32xf32>
    tpu.vector_store %arg9[%c0_54, %c0_55, %c0_56], %112 {strides = array<i32>} : memref<1x8x32xf32, #tpu.memory_space<vmem>>, vector<1x8x32xf32>,
    %114 = vector.extract_strided_slice %30 {offsets = [24, 0], sizes = [8, 8], strides = [1, 1]} : vector<32x8xf32> to vector<8x8xf32>
    %115 = vector.extract_strided_slice %31 {offsets = [24, 0], sizes = [8, 8], strides = [1, 1]} : vector<32x8xf32> to vector<8x8xf32>
    %116 = tpu.concatenate %114, %115 in 0 : vector<8x8xf32>, vector<8x8xf32> -> vector<16x8xf32>
    %117 = vector.shape_cast %116 : vector<16x8xf32> to vector<1x16x8xf32>
    %c0_57 = arith.constant 0 : index
    %c0_58 = arith.constant 0 : index
    %c0_59 = arith.constant 0 : index
    %118 = vector.load %arg10[%c0_57, %c0_58, %c0_59] : memref<1x16x8xf32, #tpu.memory_space<vmem>>, vector<1x16x8xf32>
    tpu.vector_store %arg10[%c0_57, %c0_58, %c0_59], %117 {strides = array<i32>} : memref<1x16x8xf32, #tpu.memory_space<vmem>>, vector<1x16x8xf32>,
    return
  }
  func.func @transform_0(%arg0: i32) -> (i32, i32, i32) {
    %c0_i32 = arith.constant 0 : i32
    %c0_i32_0 = arith.constant 0 : i32
    %c0_i32_1 = arith.constant 0 : i32
    return %arg0, %c0_i32, %c0_i32_0 : i32, i32, i32
  }
  func.func @transform_1(%arg0: i32) -> (i32, i32, i32) {
    %c0_i32 = arith.constant 0 : i32
    %c0_i32_0 = arith.constant 0 : i32
    %c0_i32_1 = arith.constant 0 : i32
    return %arg0, %c0_i32, %c0_i32_0 : i32, i32, i32
  }
  func.func @transform_2(%arg0: i32) -> (i32, i32, i32) {
    %c0_i32 = arith.constant 0 : i32
    %c0_i32_0 = arith.constant 0 : i32
    %c0_i32_1 = arith.constant 0 : i32
    return %arg0, %c0_i32, %c0_i32_0 : i32, i32, i32
  }
  func.func @transform_3(%arg0: i32) -> (i32, i32, i32) {
    %c0_i32 = arith.constant 0 : i32
    %c0_i32_0 = arith.constant 0 : i32
    %c0_i32_1 = arith.constant 0 : i32
    %c0_i32_2 = arith.constant 0 : i32
    return %c0_i32, %c0_i32_0, %c0_i32_1 : i32, i32, i32
  }
  func.func @transform_4(%arg0: i32) -> (i32, i32, i32) {
    %c0_i32 = arith.constant 0 : i32
    %c0_i32_0 = arith.constant 0 : i32
    %c0_i32_1 = arith.constant 0 : i32
    %c0_i32_2 = arith.constant 0 : i32
    return %c0_i32, %c0_i32_0, %c0_i32_1 : i32, i32, i32
  }
  func.func @transform_5(%arg0: i32) -> (i32, i32) {
    %c0_i32 = arith.constant 0 : i32
    %c0_i32_0 = arith.constant 0 : i32
    %c0_i32_1 = arith.constant 0 : i32
    return %c0_i32, %c0_i32_0 : i32, i32
  }
  func.func @transform_6(%arg0: i32) -> (i32, i32) {
    %c0_i32 = arith.constant 0 : i32
    %c0_i32_0 = arith.constant 0 : i32
    %c0_i32_1 = arith.constant 0 : i32
    return %c0_i32, %c0_i32_0 : i32, i32
  }
  func.func @transform_7(%arg0: i32) -> (i32, i32) {
    %c0_i32 = arith.constant 0 : i32
    %c0_i32_0 = arith.constant 0 : i32
    %c0_i32_1 = arith.constant 0 : i32
    return %c0_i32, %c0_i32_0 : i32, i32
  }
  func.func @transform_8(%arg0: i32) -> (i32, i32, i32) {
    %c0_i32 = arith.constant 0 : i32
    %c0_i32_0 = arith.constant 0 : i32
    %c0_i32_1 = arith.constant 0 : i32
    return %arg0, %c0_i32, %c0_i32_0 : i32, i32, i32
  }
  func.func @transform_9(%arg0: i32) -> (i32, i32, i32) {
    %c0_i32 = arith.constant 0 : i32
    %c0_i32_0 = arith.constant 0 : i32
    %c0_i32_1 = arith.constant 0 : i32
    return %arg0, %c0_i32, %c0_i32_0 : i32, i32, i32
  }
}

</mosaic_0001>

<bundles_post_ra>
// kernel: tpu_custom_call.1
= control target key start
LH: loop header
LB: loop body
LE: loop exit
PB: predicated region body
PF: predicated region fallthrough
CT: control target
= control target key end

     0   :  { %s1997_s0 = inlined_call_operand.hbm [shape: f32[2,8,32], index: 0, kind: input, shape index: {}]   ;;  %s1998_s1 = inlined_call_operand.hbm [shape: f32[2,8,32], index: 1, kind: input, shape index: {}]   ;;  %s1999_s2 = inlined_call_operand.hbm [shape: f32[2,8,32], index: 2, kind: input, shape index: {}]   ;;  %s2000_s3 = inlined_call_operand.hbm [shape: f32[3,32,32], index: 3, kind: input, shape index: {}]   ;;  %s2001_s4 = inlined_call_operand.vmem [shape: f32[3,1,32], index: 4, kind: input, shape index: {}]   ;;  %s2002_s5 = inlined_call_operand.hbm [shape: f32[32,32], index: 5, kind: input, shape index: {}]   ;;  %s2003_s6 = inlined_call_operand.vmem [shape: f32[1,32], index: 6, kind: input, shape index: {}]   ;;  %s2004_s7 = inlined_call_operand.vmem [shape: f32[1,8], index: 7, kind: input, shape index: {}]   ;;  %s2005_s8 = inlined_call_operand.hbm [shape: f32[2,8,32], index: 8, kind: output, shape index: {0}]   ;;  %s2006_s9 = inlined_call_operand.vmem [shape: f32[2,16,8], index: 9, kind: output, shape index: {1}]  }
   0x1   :  { %2018 = sst [smem:[#allocation22_spill]] %s1998_s1 }
   0x2   :  { %2019 = sst [smem:[#allocation23_spill]] %s2000_s3 }
   0x3   :  { %2020 = sst [smem:[#allocation24_spill]] %s2003_s6 }
   0x4   :  { %15 = vsyncpa [#allocation3], 0 }
   0x5   :  { %17 = vsyncpa [#allocation3 + $0x1], 0 }
   0x6   :  { %18 = vsyncpa [#allocation6], 0 }
   0x7   :  { %20 = vsyncpa [#allocation6 + $0x1], 0 }
   0x8   :  { %21 = vsyncpa [#allocation9], 0 }
   0x9   :  { %22 = vsyncpa [#allocation4], 0 }
   0xa   :  { %24 = vsyncpa [#allocation4 + $0x1], 0  ;;  %s1726_s30 = smov 0   ;;  %s1728_s10 = smov 0  }
   0xb   :  { %s1730_s11 = smov 0   ;;  %s1732_s12 = smov 0  }
   0xc LB: > { %2021 = sst [smem:[#allocation16_spill]] %s1658_s30  ;;  %s1750_s16 = sadd.s32 4294967295, %s1670_s12   ;;  %s1670_s12 = sphi %s1732_s12, %s2046_s12   ;;  %s1666_s11 = sphi %s1730_s11, %s2050_s11   ;;  %s1662_s10 = sphi %s1728_s10, %s2049_s10   ;;  %s1658_s30 = sphi %s1726_s30, %s2048_s30  }
   0xd   : > { %2022 = sst [smem:[#allocation17_spill]] %s1670_s12  ;;  %p1303_p0 = scmp.ge.s32.totalorder %s1670_s12, 1 }
   0xe   : > { %s2023_s3 = sld [smem:[#allocation23_spill]]  ;;  %p2017_p1 = scmp.eq.s32.totalorder %s1750_s16, 0 }
   0xf   : > { %p270_p2 = scmp.lt.s32.totalorder %s1670_s12, 3  ;;  %s1672_s18 = smov [#allocation8]  }
  0x10   : > { %s283_s19 = sshll.u32 %s1672_s18, 4  ;;  %s2007_s21 = smov 128   ;;  %s284_s19 = int_to_ptr.vmem [resolvable:$true] %s283_s19 }
  0x11   : > { %p1755_p3 = pnand %p1303_p0, %p270_p2  ;;  %s2008_s22 = smov 8  }
  0x12   : > { %s1302_s23 = sadd.s32 4294967294, %s1670_s12   ;;  %s1775_s24 = sadd.s32 1, %s1670_s12  }
  0x13   : > { %p1361_p4 = pneg %p1755_p3  ;;  %2026 = sst [smem:[#allocation18_spill]] %s1775_s24 }
  0x14   : > { %s281_s15 = sshll.u32 %s2023_s3, 4  ;;  %s37_s25 = sadd.s32 1, %s1666_s11  ;;  %s282_s15 = int_to_ptr.hbm [resolvable:$true] %s281_s15 }
  0x15   : > { %p1764_p6 = pnand %p1361_p4, %p2017_p1  ;;  %s34_s26 = ssub.s32 %s1670_s12, %s1775_s24 }
  0x16   : > { %p44_p7 = scmp.ne.s32.totalorder %s1666_s11, %s1662_s10  ;;  %p35_p8 = scmp.eq.s32.totalorder %s34_s26, 0 }
  0x17   : > { %1364 = dma.hbm_to_vmem [thread:$0]  (!%p1764_p6), %s282_s15, 1536, %s284_s19, [#allocation9], %s2007_s21, %s2007_s21, %s2008_s22  }
  0x18   : > { %p45_p9 = scmp.eq.s32.totalorder %s1670_s12, 0  ;;  %p50_p10 = scmp.ne.s32.totalorder %s1662_s10, %s1658_s30 }
  0x19   : > { %p231_p11 = scmp.eq.s32.totalorder %s1750_s16, 1  ;;  %p237_p2 = scmp.eq.s32.totalorder %s1302_s23, 1 }
  0x1a   : > { %s1787_s27 = scalar_select %p35_p8, %s1666_s11, %s37_s25  }
  0x1b   : > { %p46_p12 = por %p45_p9, %p44_p7  ;;  %p1791_p13 = por %p2017_p1, %p50_p10 }
  0x1c   : > { %2027 = sst [smem:[#allocation19_spill]] %s1787_s27  ;;  %p1795_p0 = por %p231_p11, %p44_p7 }
  0x1d   : > { %p1384_p4 = scmp.lt.s32.totalorder %s1670_s12, 2  ;;  %s2009_s13 = sand.u32 1, %s1666_s11  }
  0x1e   : > { %s2029_s29 = scalar_select %p1795_p0, 1, 0 }
  0x1f   : > { %p1801_p5 = por %p237_p2, %p50_p10  ;;  %s1807_s15 = sshll.u32 %s2009_s13, 3 }
  0x20   : > { %2030 = sst [smem:[#allocation20_spill]] %s2029_s29  ;;  %s1810_s18 = sshll.u32 %s1670_s12, 3 }
  0x21   : > { %s2031_s14 = scalar_select %p1801_p5, 1, 0 }
  0x22   : > { %p1812_p8 = pnand %p1384_p4, %p46_p12  ;;  %s339_s23 = sand.u32 1, %s1670_s12  }
  0x23   : > { %2032 = sst [smem:[#allocation21_spill]] %s2031_s14  ;;  %s343_s22 = scalar_lea.vmem [#allocation5], %s1807_s15 }
  0x24   : > { %s2034_s1 = sld [smem:[#allocation22_spill]]  ;;  %s351_s3 = sshll.u32 %s343_s22, 4  ;;  %s352_s3 = int_to_ptr.vmem [resolvable:$true] %s351_s3 }
  0x25   : > { %s298_s14 = sshll.u32 %s2002_s5, 4  ;;  %s1825_s30 = scalar_lea.sflag [#allocation6], %s339_s23  ;;  %s299_s14 = int_to_ptr.hbm [resolvable:$true] %s298_s14 }
  0x26   : > { %p1480_p9 = pneg %p1812_p8 }
  0x2a   : > { %s347_s21 = scalar_lea.hbm %s2034_s1, %s1810_s18  ;;  %s1483_s25 = scalar_lea.hbm %s2034_s1, 16 }
  0x2b   : > { %s349_s27 = sshll.u32 %s347_s21, 4  ;;  %s350_s27 = int_to_ptr.hbm [resolvable:$true] %s349_s27 }
  0x2c   : > { %s1476_s6 = sshra.s32 %s350_s27, 4  ;;  %s1477_s6 = int_to_ptr.hbm [resolvable:$true] %s1476_s6 }
  0x2d   : > { %s1478_s29 = scalar_lea.hbm %s1477_s6, 8  ;;  %p1484_p12 = scmp.lt.s32.totalorder %s1477_s6, %s2034_s1 }
  0x2e   : > { %p1479_p7 = scmp.ne.s32.totalorder %s1477_s6, %s1478_s29  ;;  %p1485_p2 = scmp.lt.s32.totalorder %s1483_s25, %s1478_s29 }
  0x30   : > { %p1481_p10 = pnand %p1480_p9, %p1479_p7  ;;  %p1486_p4 = por %p1485_p2, %p1484_p12 }
  0x32   : > { %p1482_p11 = pneg %p1481_p10 }
  0x34   : > { %p1487_p1 = pnand %p1486_p4, %p1482_p11 }
  0x36   : > { %1490 = shalt.err (!%p1487_p1)
}
  0x37   : > { %1374 = dma.hbm_to_vmem [thread:$0]  (!%p1812_p8), %s350_s27, 128, %s352_s3, %s1825_s30  }
  0x38   : > { %s1675_s24 = smov [#allocation10]   ;;  %s2035_s12 = smov 8  }
  0x39   : > { %s300_s13 = sshll.u32 %s1675_s24, 4  ;;  %s2036_s6 = smov 128   ;;  %s301_s13 = int_to_ptr.vmem [resolvable:$true] %s300_s13 }
  0x3a   : > { %1367 = dma.hbm_to_vmem [thread:$0]  (!%p1764_p6), %s299_s14, 512, %s301_s13, [#allocation9], %s2036_s6, %s2036_s6, %s2035_s12  }
  0x3b   : > { %s328_s22 = scalar_lea.hbm %s1997_s0, %s1810_s18  ;;  %s324_s21 = scalar_lea.vmem [#allocation2], %s1807_s15 }
  0x3c   : > { %s332_s25 = sshll.u32 %s324_s21, 4  ;;  %s330_s26 = sshll.u32 %s328_s22, 4  ;;  %s333_s25 = int_to_ptr.vmem [resolvable:$true] %s332_s25  ;;  %s331_s26 = int_to_ptr.hbm [resolvable:$true] %s330_s26 }
  0x3d   : > { %s2037_s3 = sand.u32 1, %s1666_s11   ;;  %s1536_s1 = sshra.s32 %s331_s26, 4  ;;  %s1537_s1 = int_to_ptr.hbm [resolvable:$true] %s1536_s1 }
  0x3e   : > { %s321_s27 = scalar_lea.sflag [#allocation3], %s2037_s3  ;;  %s1538_s24 = scalar_lea.hbm %s1537_s1, 8 }
  0x3f   : > { %p1539_p1 = scmp.ne.s32.totalorder %s1537_s1, %s1538_s24  ;;  %s1543_s13 = scalar_lea.hbm %s1997_s0, 16 }
  0x40   : > { %p1544_p6 = scmp.lt.s32.totalorder %s1537_s1, %s1997_s0  ;;  %p1545_p11 = scmp.lt.s32.totalorder %s1543_s13, %s1538_s24 }
  0x41   : > { %p1541_p7 = pnand %p1539_p1, %p1480_p9 }
  0x42   : > { %p1546_p12 = por %p1545_p11, %p1544_p6 }
  0x43   : > { %p1542_p10 = pneg %p1541_p7 }
  0x45   : > { %p1547_p2 = pnand %p1546_p12, %p1542_p10 }
  0x47   : > { %1550 = shalt.err (!%p1547_p2)
}
  0x48   : > { %1371 = dma.hbm_to_vmem [thread:$0]  (!%p1812_p8), %s331_s26, 128, %s333_s25, %s321_s27  }
  0x49   : > { %s366_s22 = scalar_lea.hbm %s1999_s2, %s1810_s18  ;;  %s362_s21 = scalar_lea.vmem [#allocation7], %s1807_s15 }
  0x4a   : > { %s370_s3 = sshll.u32 %s362_s21, 4  ;;  %s368_s20 = sshll.u32 %s366_s22, 4  ;;  %s371_s3 = int_to_ptr.vmem [resolvable:$true] %s370_s3  ;;  %s369_s20 = int_to_ptr.hbm [resolvable:$true] %s368_s20 }
  0x4b   : > { %s1566_s1 = sshra.s32 %s369_s20, 4  ;;  %s1573_s25 = scalar_lea.hbm %s1999_s2, 16  ;;  %s1567_s1 = int_to_ptr.hbm [resolvable:$true] %s1566_s1 }
  0x4c   : > { %s1568_s24 = scalar_lea.hbm %s1567_s1, 8  ;;  %p1574_p10 = scmp.lt.s32.totalorder %s1567_s1, %s1999_s2 }
  0x4d   : > { %p1569_p4 = scmp.ne.s32.totalorder %s1567_s1, %s1568_s24  ;;  %p1575_p6 = scmp.lt.s32.totalorder %s1573_s25, %s1568_s24 }
  0x4f   : > { %p1571_p1 = pnand %p1569_p4, %p1480_p9  ;;  %p1576_p11 = por %p1575_p6, %p1574_p10 }
  0x51   : > { %p1572_p7 = pneg %p1571_p1 }
  0x53   : > { %p1577_p12 = pnand %p1576_p11, %p1572_p7 }
  0x55   : > { %1580 = shalt.err (!%p1577_p12)
}
  0x56   : > { %1377 = dma.hbm_to_vmem [thread:$0]  (!%p1812_p8), %s369_s20, 128, %s371_s3, %s1825_s30  }
  0x57   : > { %379 = sbr.rel (%p1755_p3) target bundleno = 1457 (0x5b1), region = 52  ;;  %s1884_s15 = sand.u32 (!%p1755_p3), 1, %s1662_s10  }
  0x58   : > { %s1887_s18 = sshll.u32 (!%p1755_p3), %s1884_s15, 3  ;;  %s382_s12 = scalar_lea.sflag (!%p1755_p3), [#allocation3], %s1884_s15 }
  0x59   : > { %s385_s6 = scalar_lea.vmem (!%p1755_p3), [#allocation2], %s1887_s18 }
  0x5c   : > { %1641 = dma.done.wait (%p1791_p13), %s382_s12, 128  }
  0x5d   : > { %1643 = vsyncadd (%p1791_p13), %s382_s12, 4294967168  ;;  %s391_s30 = sand.u32 1, %s1750_s16   ;;  %s395_s19 = scalar_lea.vmem [#allocation5], %s1887_s18 }
  0x5e   : > { %s392_s17 = scalar_lea.sflag [#allocation6], %s391_s30 }
  0x5f   : > { %1645 = dma.done.wait (%p1791_p13), %s392_s17, 256  }
  0x60   : > { %1647 = vsyncadd (%p1791_p13), %s392_s17, 4294967040  ;;  %s405_s29 = scalar_lea.vmem [#allocation7], %s1887_s18  ;;  %p2038_p3 = scmp.eq.s32.totalorder %s1750_s16, 0 }
  0x62   : > { %1649 = dma.done.wait (%p2038_p3), [#allocation9], 2048   ;;  %p2039_p8 = pmov %p2038_p3 }
  0x63   : > { %v544_v0 = vld [vmem:[#allocation8 + $0x18] sm:$0xff]  ;;  %v543_v1 = vld [vmem:[#allocation8 + $0x10] sm:$0xff]  ;;  %v542_v2 = vld [vmem:[#allocation8 + $0x8] sm:$0xff]  ;;  %vm483_vm0 = vcmask 261120   ;;  %p466_p13 = scmp.lt.s32.totalorder %s1750_s16, 1  ;;  %vm706_vm1 = vcmask 64512   ;;  %v669_v29 = vlaneseq }
  0x64   : > { %1651 = vsyncadd (%p2039_p8), [#allocation9], 4294965248  ;;  %564 = vmatpush.msra.mxu2 %v544_v0  ;;  %v541_v3 = vld [vmem:[#allocation8] sm:$0xff]  ;;  %v540_v4 = vld [vmem:[%s385_s6] sm:$0xff]  ;;  %s1341_s12 = sshll.u32 %s1750_s16, 3  ;;  %s2041_s23 = sld [smem:[#allocation24_spill]] }
  0x65   : > { %v477_v5 = vld [vmem:[#allocation8 + $0x38] sm:$0xff]  ;;  %v476_v6 = vld [vmem:[#allocation8 + $0x30] sm:$0xff]  ;;  %v475_v7 = vld [vmem:[#allocation8 + $0x28] sm:$0xff]  ;;  %s467_s3 = scalar_select %p466_p13, %s1750_s16, 1  ;;  %v670_v30 = vshrl.u32 %v669_v29, 7  ;;  %v672_v31 = vand.u32 127, %v669_v29 }
  0x66   : > { %565 = vmatpush.msra.mxu2 %v543_v1  ;;  %499 = vmatpush.msra.mxu0 %v477_v5  ;;  %v474_v8 = vld [vmem:[#allocation8 + $0x20] sm:$0xff]  ;;  %v1425_v10 = vld [vmem:[%s2001_s4] ss:$0 sm:$0xff]  ;;  %v1426_v14 = vld [vmem:[%s2001_s4 + $0x1] ss:$0 sm:$0xff]  ;;  %s458_s22 = scalar_lea.vmem [#allocation11], %s1887_s18 }
  0x67   : > { %v471_v9 = vld [vmem:[%s395_s19] sm:$0xff]  ;;  %s1344_s20 = sshll.u32 %s467_s3, 4  ;;  %v511_v32 = vld [vmem:[#allocation8 + $0x58] sm:$0xff]  ;;  %v510_v33 = vld [vmem:[#allocation8 + $0x50] sm:$0xff]  ;;  %vm673_vm2 = vcmp.le.s32.totalorder %v672_v31, %v670_v30  ;;  %s1137_s19 = scalar_lea.hbm %s2005_s8, %s1341_s12 }
  0x68   : > { %566 = vmatpush.msra.mxu2 %v542_v2  ;;  %500 = vmatpush.msra.mxu0 %v476_v6  ;;  %s1919_s14 = scalar_lea.vmem %s2006_s9, %s1344_s20  ;;  %v509_v34 = vld [vmem:[#allocation8 + $0x48] sm:$0xff]  ;;  %v508_v36 = vld [vmem:[#allocation8 + $0x40] sm:$0xff]  ;;  %v472_v38 = vld [vmem:[%s405_s29] sm:$0xff]  ;;  %s1139_s21 = sshll.u32 %s458_s22, 4  ;;  %s1140_s21 = int_to_ptr.vmem [resolvable:$true] %s1139_s21 }
  0x69   : > { %532 = vmatpush.msra.mxu1 %v511_v32  ;;  %v1427_v5 = vld [vmem:[%s2001_s4 + $0x2] ss:$0 sm:$0xff]  ;;  %s1141_s3 = sshll.u32 %s1137_s19, 4  ;;  %s1122_s20 = scalar_lea.sflag [#allocation4], %s1884_s15  ;;  %s1142_s3 = int_to_ptr.hbm [resolvable:$true] %s1141_s3 }
  0x6a   : > { %567 = vmatpush.msra.mxu2 %v541_v3  ;;  %501 = vmatpush.msra.mxu0 %v475_v7  ;;  %s1610_s16 = sshra.s32 %s1142_s3, 4  ;;  %s1616_s18 = scalar_lea.hbm %s2005_s8, 16  ;;  %s1611_s16 = int_to_ptr.hbm [resolvable:$true] %s1610_s16 }
  0x6b   : > { %1326 = vmatmul.msk.f32.vlgmr.msra.gmra.mxu2 %vm483_vm0, %v540_v4  ;;  %533 = vmatpush.msra.mxu1 %v510_v33  ;;  %s1612_s1 = scalar_lea.hbm %s1611_s16, 8  ;;  %p1617_p1 = scmp.lt.s32.totalorder %s1611_s16, %s2005_s8 }
  0x6c   : > { %502 = vmatpush.msra.mxu0 %v474_v8  ;;  %p1613_p9 = scmp.ne.s32.totalorder %s1611_s16, %s1612_s1  ;;  %p1618_p7 = scmp.lt.s32.totalorder %s1616_s18, %s1612_s1 }
  0x6d   : > { %1323 = vmatmul.msk.f32.vlgmr.msra.gmra.mxu0 %vm483_vm0, %v471_v9  ;;  %534 = vmatpush.msra.mxu1 %v509_v34 }
  0x6e   : > { %p1614_p2 = pnand %p1613_p9, %p1795_p0  ;;  %p1619_p10 = por %p1618_p7, %p1617_p1 }
  0x6f   : > { %535 = vmatpush.msra.mxu1 %v508_v36 }
  0x70   : > { %1325 = vmatmul.msk.f32.vlgmr.msra.gmra.mxu1 %vm483_vm0, %v472_v38  ;;  %v1429_v38 = vld [vmem:[%s2041_s23] ss:$0 sm:$0xff]  ;;  %p1615_p4 = pneg %p1614_p2 }
  0x72   : > { %p1620_p6 = pnand %p1619_p10, %p1615_p4 }
  0xea   : > { %v504_v15 = vpop.f32.mrf.mxu0 }
  0xeb   : > { %v505_v16 = vadd.f32 %v1426_v14, %v504_v15 }
  0xed   : > { %v537_v6 = vpop.f32.mrf.mxu1 }
  0xee   : > { %v569_v11 = vpop.f32.mrf.mxu2  ;;  %v538_v7 = vadd.f32 %v1427_v5, %v537_v6 }
  0xef   : > { %v570_v12 = vadd.f32 %v1425_v10, %v569_v11 }
  0xf1   : > { %v572_v13 = vmul.f32 0.35355338, %v570_v12 }
  0xf3   : > { %573 = vxpose.xlu0.b32.start.end [1/1] (short) (narrow) %v572_v13, 32 }
 0x113   : > { %605 = vxpose.xlu0.b32.start.end [1/1] (short) (narrow) %v505_v16, 32 }
 0x197   : > { %v589_v17 = vpop.trf.xlu0 }
 0x198   : > { %674 = vxpose.xlu1.b32.start.end [1/1] (short) (narrow) %v589_v17, 8 }
 0x19f   : > { %v590_v18 = vpop.trf.xlu0 }
 0x1a0   : > { %768 = vxpose.xlu2.b32.start.end [1/1] (short) (narrow) %v590_v18, 8 }
 0x1a7   : > { %v591_v19 = vpop.trf.xlu0 }
 0x1a8   : > { %861 = vxpose.xlu1.b32.start.end [1/1] (short) (narrow) %v591_v19, 8 }
 0x1af   : > { %v592_v20 = vpop.trf.xlu0 }
 0x1b0   : > { %954 = vxpose.xlu2.b32.start.end [1/1] (short) (narrow) %v592_v20, 8 }
 0x1b7   : > { %v621_v21 = vpop.trf.xlu0 }
 0x1b8   : > { %725 = vmatpush.msra.mxu3 %v621_v21 }
 0x1bf   : > { %v622_v22 = vpop.trf.xlu0 }
 0x1c0   : > { %818 = vmatpush.msrb.mxu0 %v622_v22 }
 0x1c7   : > { %v623_v23 = vpop.trf.xlu0 }
 0x1c8   : > { %911 = vmatpush.msrb.mxu2 %v623_v23 }
 0x1cf   : > { %v624_v24 = vpop.trf.xlu0 }
 0x1d0   : > { %1119 = vst.msk [vmem:[%s1919_s14] sm:$0xff] %vm706_vm1, %v624_v24  ;;  %1004 = vmatpush.msra.mxu0 %v624_v24  ;;  %v1058_v24 = vld [vmem:[#allocation10 + $0x18] sm:$0xff] }
 0x1d1   : > { %1110 = vmatpush.msra.mxu2 %v1058_v24 }
 0x239   : > { %v784_v25 = vpop.trf.xlu2 }
 0x23a   : > { %1330 = vmatmul.msk.f32.vlgmr.msrb.gmra.mxu0 %vm706_vm1, %v784_v25  ;;  %v1057_v25 = vld [vmem:[#allocation10 + $0x10] sm:$0xff] }
 0x23b   : > { %1111 = vmatpush.msra.mxu2 %v1057_v25 }
 0x23c   : > { %v690_v26 = vpop.trf.xlu1 }
 0x23d   : > { %1327 = vmatmul.msk.f32.vlgmr.msra.gmra.mxu3 %vm706_vm1, %v690_v26  ;;  %v1428_v26 = vld [vmem:[%s2004_s7] ss:$0 sm:$0xff] }
 0x249   : > { %v970_v27 = vpop.trf.xlu2 }
 0x24a   : > { %1336 = vmatmul.msk.f32.vlgmr.msra.gmra.mxu0 %vm706_vm1, %v970_v27  ;;  %v1056_v27 = vld [vmem:[#allocation10 + $0x8] sm:$0xff] }
 0x24b   : > { %1112 = vmatpush.msra.mxu2 %v1056_v27 }
 0x24c   : > { %v877_v28 = vpop.trf.xlu1 }
 0x24d   : > { %1333 = vmatmul.msk.f32.vlgmr.msrb.gmra.mxu2 %vm706_vm1, %v877_v28  ;;  %v1055_v28 = vld [vmem:[#allocation10] sm:$0xff] }
 0x24e   : > { %1113 = vmatpush.msra.mxu2 %v1055_v28 }
 0x2b7   : > { %v820_v35 = vpop.f32.mrf.mxu0 }
 0x2b8   : > { %v823_v37 = vsel %vm673_vm2, %v820_v35, -1000.0 }
 0x2b9   : > { %v824_v39 = vsel %vm706_vm1, %v823_v37, -inf }
 0x2ba   : > { %825 = vmax.xlane.f32.xlu0 %v824_v39 }
 0x2c0   : > { %v727_v40 = vpop.f32.mrf.mxu3 }
 0x2c1   : > { %v730_v41 = vsel %vm673_vm2, %v727_v40, -1000.0 }
 0x2c2   : > { %v731_v42 = vsel %vm706_vm1, %v730_v41, -inf }
 0x2c3   : > { %732 = vmax.xlane.f32.xlu1 %v731_v42 }
 0x2c7   : > { %v1006_v43 = vpop.f32.mrf.mxu0 }
 0x2c8   : > { %v1009_v44 = vsel %vm673_vm2, %v1006_v43, -1000.0 }
 0x2c9   : > { %v1010_v45 = vsel %vm706_vm1, %v1009_v44, -inf }
 0x2cb   : > { %1011 = vmax.xlane.f32.xlu1 %v1010_v45 }
 0x2d0   : > { %v913_v46 = vpop.f32.mrf.mxu2 }
 0x2d1   : > { %v916_v47 = vsel %vm673_vm2, %v913_v46, -1000.0 }
 0x2d2   : > { %v917_v48 = vsel %vm706_vm1, %v916_v47, -inf }
 0x2d3   : > { %918 = vmax.xlane.f32.xlu2 %v917_v48 }
 0x32d   : > { %v826_v49 = vpop.xlane.xlu0 %825 }
 0x32e   : > { %v827_v50 = vsub.f32 %v823_v37, %v826_v49 }
 0x330   : > { %v828_v51 = vmul.f32 1.442695, %v827_v50 }
 0x332   : > { %1430 = vpow2.f32 %v828_v51 }
 0x336   : > { %v733_v52 = vpop.xlane.xlu1 %732 }
 0x337   : > { %v734_v53 = vsub.f32 %v730_v41, %v733_v52 }
 0x338   : > { %v1431_v54 = vpop.eup %1430 }
 0x339   : > { %v735_v55 = vmul.f32 1.442695, %v734_v53  ;;  %v830_v56 = vsel %vm706_vm1, %v1431_v54, 0.0 }
 0x33a   : > { %831 = vadd.xlane.f32.xlu2 %v830_v56 }
 0x33b   : > { %1432 = vpow2.f32 %v735_v55 }
 0x33e   : > { %v1012_v59 = vpop.xlane.xlu1 %1011 }
 0x33f   : > { %v1013_v62 = vsub.f32 %v1009_v44, %v1012_v59 }
 0x341   : > { %v1433_v57 = vpop.eup %1432  ;;  %v1014_v0 = vmul.f32 1.442695, %v1013_v62 }
 0x342   : > { %v737_v58 = vsel %vm706_vm1, %v1433_v57, 0.0 }
 0x343   : > { %738 = vadd.xlane.f32.xlu1 %v737_v58 }
 0x346   : > { %v919_v60 = vpop.xlane.xlu2 %918 }
 0x347   : > { %v920_v61 = vsub.f32 %v916_v47, %v919_v60 }
 0x349   : > { %v921_v63 = vmul.f32 1.442695, %v920_v61 }
 0x34b   : > { %1434 = vpow2.f32 %v921_v63 }
 0x34c   : > { %1436 = vpow2.f32 %v1014_v0 }
 0x351   : > { %v1435_v1 = vpop.eup %1434 }
 0x352   : > { %v923_v2 = vsel %vm706_vm1, %v1435_v1, 0.0  ;;  %v1437_v3 = vpop.eup %1436 }
 0x353   : > { %924 = vadd.xlane.f32.xlu1 %v923_v2  ;;  %v1016_v4 = vsel %vm706_vm1, %v1437_v3, 0.0 }
 0x35b   : > { %1017 = vadd.xlane.f32.xlu1 %v1016_v4 }
 0x363   : > { %637 = vxpose.xlu2.b32.start.end [1/1] (short) (narrow) %v538_v7, 32 }
 0x3ad   : > { %v832_v8 = vpop.xlane.xlu2 %831 }
 0x3ae   : > { %1438 = vrcp.f32 %v832_v8 }
 0x3b4   : > { %v1439_v9 = vpop.eup %1438 }
 0x3b5   : > { %v834_v10 = vmul.f32 %v1439_v9, %v1431_v54 }
 0x3b6   : > { %v739_v11 = vpop.xlane.xlu1 %738 }
 0x3b7   : > { %1440 = vrcp.f32 %v739_v11  ;;  %1331 = vmatpush.xpose.msk.msrb.mxu1 %vm706_vm1, %v834_v10 }
 0x3bd   : > { %v1441_v12 = vpop.eup %1440 }
 0x3be   : > { %v741_v13 = vmul.f32 %v1441_v12, %v1433_v57 }
 0x3c0   : > { %1328 = vmatpush.xpose.msk.msrb.mxu3 %vm706_vm1, %v741_v13 }
 0x3c6   : > { %v925_v14 = vpop.xlane.xlu1 %924 }
 0x3c7   : > { %1442 = vrcp.f32 %v925_v14 }
 0x3cd   : > { %v1443_v15 = vpop.eup %1442 }
 0x3ce   : > { %v927_v16 = vmul.f32 %v1443_v15, %v1435_v1  ;;  %v1018_v17 = vpop.xlane.xlu1 %1017 }
 0x3cf   : > { %1444 = vrcp.f32 %v1018_v17 }
 0x3d0   : > { %1334 = vmatpush.xpose.msk.msra.mxu3 %vm706_vm1, %v927_v16 }
 0x3d5   : > { %v1445_v18 = vpop.eup %1444 }
 0x3d6   : > { %v1020_v19 = vmul.f32 %v1445_v18, %v1437_v3 }
 0x3d8   : > { %1337 = vmatpush.xpose.msk.msra.mxu1 %vm706_vm1, %v1020_v19 }
 0x3fc   : > { %v653_v20 = vpop.trf.xlu2 }
 0x3fd   : > { %1329 = vmatmul.msk.f32.vlgmr.msrb.gmra.mxu3 %vm706_vm1, %v653_v20 }
 0x404   : > { %v654_v21 = vpop.trf.xlu2 }
 0x405   : > { %1332 = vmatmul.msk.f32.vlgmr.msrb.gmra.mxu1 %vm706_vm1, %v654_v21 }
 0x40c   : > { %v655_v22 = vpop.trf.xlu2 }
 0x40d   : > { %1335 = vmatmul.msk.f32.vlgmr.msra.gmra.mxu3 %vm706_vm1, %v655_v22 }
 0x414   : > { %v656_v23 = vpop.trf.xlu2 }
 0x415   : > { %1120 = vst.msk [vmem:[%s1919_s14 + $0x8] sm:$0xff] %vm706_vm1, %v656_v23  ;;  %1338 = vmatmul.msk.f32.vlgmr.msra.gmra.mxu1 %vm706_vm1, %v656_v23 }
 0x480   : > { %v765_v29 = vpop.f32.mrf.mxu3 }
 0x481   : > { %v1051_v30 = vmul.f32 %v1428_v26, %v765_v29 }
 0x482   : > { %v858_v31 = vpop.f32.mrf.mxu1 }
 0x483   : > { %1063 = vxpose.xlu1.b32.start [1/4] (short) (narrow) %v1051_v30, 8  ;;  %v1052_v32 = vmul.f32 %v1428_v26, %v858_v31 }
 0x48b   : > { %1064 = vxpose.xlu1.b32.cont [2/4] (short) (narrow) %v1052_v32, 8 }
 0x490   : > { %v951_v33 = vpop.f32.mrf.mxu3 }
 0x491   : > { %v1053_v34 = vmul.f32 %v1428_v26, %v951_v33 }
 0x492   : > { %v1044_v35 = vpop.f32.mrf.mxu1 }
 0x493   : > { %1065 = vxpose.xlu1.b32.cont [3/4] (short) (narrow) %v1053_v34, 8  ;;  %v1054_v36 = vmul.f32 %v1428_v26, %v1044_v35 }
 0x49b   : > { %1066 = vxpose.xlu1.b32.end [4/4] (short) (narrow) %v1054_v36, 8 }
 0x527   : > { %v1079_v37 = vpop.trf.xlu1 }
 0x528   : > { %1339 = vmatmul.msk.f32.vlgmr.msra.gmra.mxu2 %vm483_vm0, %v1079_v37 }
 0x5ab   : > { %v1115_v39 = vpop.f32.mrf.mxu2 }
 0x5ac   : > { %v1116_v40 = vadd.f32 %v1429_v38, %v1115_v39 }
 0x5ae   : > { %1118 = vst.msk [vmem:[%s458_s22] sm:$0xff] %vm483_vm0, %v1116_v40 }
 0x5af   : > { %1623 = shalt.err (!%p1620_p6)
}
 0x5b0   : > { %1359 = dma.vmem_to_hbm [thread:$0]  (%p1795_p0), %s1140_s21, 128, %s1142_s3, %s1122_s20  }
 0x5b1 PF: > { %s2042_s15 = sld [smem:[#allocation16_spill]] }
 0x5b2   : > { %s2044_s27 = sld [smem:[#allocation17_spill]] }
 0x5b7   : > { %s1156_s12 = sand.u32 1, %s2042_s15  }
 0x5b8   : > { %p2045_p11 = scmp.ge.s32.totalorder %s2044_s27, 2  ;;  %s1157_s6 = scalar_lea.sflag [#allocation4], %s1156_s12 }
 0x5ba   : > { %p1379_p12 = pnand %p2045_p11, %p1801_p5 }
 0x5bc   : > { %p1380_p3 = pneg %p1379_p12 }
 0x5be   : > { %1653 = dma.done.wait (%p1380_p3), %s1157_s6, 128  }
 0x5bf   : > { %1655 = vsyncadd (%p1380_p3), %s1157_s6, 4294967168  ;;  %s2046_s12 = sld [smem:[#allocation18_spill]]  ;;  %s2048_s30 = smov %s1662_s10 }
 0x5c0   : > { %s2047_s19 = sld [smem:[#allocation19_spill]]  ;;  %s2049_s10 = smov %s1666_s11 }
 0x5c5   : > { %p27_p8 = scmp.ge.s32.totalorder %s2046_s12, 4  }
 0x5c6   : > { %s2050_s11 = smov %s2047_s19 }
 0x5c7   :  { %29 = sbr.rel (!%p27_p8) target bundleno = 12 (0xc), region = 145 }
 0x5cc   :  { %1171 = vsyncpa [#allocation3], 1 }
 0x5cd   :  { %1173 = vsyncpa [#allocation3 + $0x1], 1 }
 0x5ce   :  { %1174 = vsyncpa [#allocation6], 1 }
 0x5cf   :  { %1176 = vsyncpa [#allocation6 + $0x1], 1 }
 0x5d0   :  { %1177 = vsyncpa [#allocation9], 1 }
 0x5d1   :  { %1178 = vsyncpa [#allocation4], 1 }
 0x5d2   :  { %1180 = vsyncpa [#allocation4 + $0x1], 1 }

</bundles_post_ra>
